<compile_context>
chip_gen: v6e
topology: v6e:2x2x1
jax: 0.10.0
libtpu: 0.0.40
codegen_flags: <defaults>
</compile_context>

<pallas_src>
import functools

import jax
import jax.numpy as jnp
from jax import lax
from jax.experimental import pallas as pl
from jax.experimental.pallas import tpu as pltpu


def _round_up(a, b):
    return (a + b - 1) // b * b


def _cdiv(a, b):
    return -(-a // b)


def _probe_single_buffering():
    """Check that pipeline_mode=pl.Buffered(1) is supported on this jax/TPU."""
    try:
        def _k(a_ref, b_ref, o_ref):
            o_ref[...] = a_ref[...] + b_ref[...]

        fn = pl.pallas_call(
            _k,
            out_shape=jax.ShapeDtypeStruct((16, 128), jnp.float32),
            grid=(2,),
            in_specs=[
                pl.BlockSpec((8, 128), lambda i: (i, 0)),
                pl.BlockSpec((8, 128), lambda i: (0, 0),
                             pipeline_mode=pl.Buffered(1)),
            ],
            out_specs=pl.BlockSpec((8, 128), lambda i: (i, 0)),
        )
        jax.block_until_ready(
            fn(jnp.zeros((16, 128), jnp.float32), jnp.zeros((8, 128), jnp.float32)))
        return True
    except Exception:
        return False


_SINGLE_BUFFER_OK = _probe_single_buffering()


def _vmem_budget():
    """(tile-selection target bytes, vmem_limit cap bytes) per TPU generation."""
    try:
        kind = jax.devices()[0].device_kind.lower()
    except Exception:
        kind = ""
    if "v7" in kind:          # 64 MiB VMEM per TensorCore
        return 20 << 20, 48 << 20
    return 32 << 20, 80 << 20  # v5e / v6e: 128 MiB physical


def _choose_tile_r(h, w8, c_in, p2, n_batch, vmem_target, min_steps=8):
    # rough per-input-row VMEM working set: streamed x (double buffered) +
    # shifted copies + f32 accumulator + bf16 output tile (double buffered).
    per_row = w8 * (24 * c_in + 48 * p2)
    tile_r = max(1, min(h, vmem_target // max(per_row, 1)))
    # keep enough grid steps for pipelining + megacore (v7x wants >=4 per core)
    while tile_r > 1 and n_batch * _cdiv(h, tile_r) < min_steps:
        tile_r = _cdiv(tile_r, 2)
    return int(tile_r)


def _upsample_conv_kernel(x_ref, xh_ref, w_ref, p_ref, o_ref, *, split):
    # x_ref : (M1, C_in)            bf16  tile_r image rows, W8 pixels each (flattened)
    # xh_ref: (W8, C_in)            bf16  halo = first image row below the block
    # w_ref : (4*C_in, 4*P2)        bf16  parity weight mats [ee|eo|oe|oo] (resident)
    # p_ref : (8, 4*P2)             f32   row0 conv bias, row1 BN scale, row2 BN shift
    # o_ref : (tile_r, 2, W8, 2*P2) bf16  row-parity-interleaved output tile
    m1, c_in = x_ref.shape
    w8 = xh_ref.shape[0]
    tile_r = o_ref.shape[0]
    half = o_ref.shape[3]                 # 2 * c_out_pad, multiple of 128

    # ---- shifted input views built in VMEM (no HBM x_cat) ----
    x00 = x_ref[...]                                              # x[r, s]
    if m1 == w8:                                                  # tile_r == 1
        x10 = xh_ref[...]                                         # x[r+1, s]
    else:
        x10 = jnp.concatenate([x_ref[w8:, :], xh_ref[...]], axis=0)

    zrow = jnp.zeros((1, c_in), x00.dtype)
    not_last_col = (lax.broadcasted_iota(jnp.int32, (m1, 1), 0) % w8) != (w8 - 1)

    def right_neighbour(v):
        # flattened shift by one pixel; zero the (out-of-image) last column.
        s = jnp.concatenate([v[1:, :], zrow], axis=0)
        return jnp.where(not_last_col, s, 0)

    x01 = right_neighbour(x00)                                    # x[r, s+1]
    x11 = right_neighbour(x10)                                    # x[r+1, s+1]

    # ---- GEMM(s): bf16 in, f32 accumulate ----
    if split:
        # even output rows only need the x00/x01 K blocks -> skip zero blocks.
        lhs_e = jnp.concatenate([x00, x01], axis=-1)              # (M1, 2C)
        lhs_o = jnp.concatenate([lhs_e, x10, x11], axis=-1)       # (M1, 4C)
        acc_e = jnp.dot(lhs_e, w_ref[: 2 * c_in, :half],
                        preferred_element_type=jnp.float32)
        acc_o = jnp.dot(lhs_o, w_ref[:, half:],
                        preferred_element_type=jnp.float32)
    else:
        lhs = jnp.concatenate([x00, x01, x10, x11], axis=-1)      # (M1, 4C)
        acc = jnp.dot(lhs, w_ref[...], preferred_element_type=jnp.float32)
        acc_e = acc[:, :half]
        acc_o = acc[:, half:]

    # ---- fused epilogue: bias -> ReLU -> BN(eval) affine -> bf16 ----
    def epilogue(a, lo):
        a = a + p_ref[0:1, lo:lo + half]
        a = jnp.maximum(a, 0.0)
        a = a * p_ref[1:2, lo:lo + half] + p_ref[2:3, lo:lo + half]
        return a.astype(o_ref.dtype).reshape(tile_r, 1, w8, half)

    # in-kernel un-parity: even / odd output rows land in the size-2 middle dim.
    o_ref[:, 0:1, :, :] = epilogue(acc_e, 0)
    o_ref[:, 1:2, :, :] = epilogue(acc_o, half)


@functools.partial(jax.jit, static_argnames=("out_dtype",))
def upsample_conv(x, weight_t, conv_bias, gamma, beta, run_mean, run_var,
                  eps=1e-5, out_dtype=None):
    """x: (N, C_in, H, W) NCHW; weight_t: (C_in, C_out, 3, 3) (PyTorch ConvTranspose2d)."""
    n, c_in, h, w = x.shape
    c_out = weight_t.shape[1]
    out_dtype = x.dtype if out_dtype is None else out_dtype

    w8 = _round_up(w, 8)                   # sublane-aligned row width
    p2 = _round_up(c_out, 64)              # per-parity C_out pad -> 2*p2 % 128 == 0
    n4 = 4 * p2
    half = 2 * p2

    vmem_target, vmem_cap = _vmem_budget()
    tile_r = _choose_tile_r(h, w8, c_in, p2, n, vmem_target)
    h_pad = _round_up(h, tile_r)
    h_blk = h_pad + tile_r                 # zero rows: bottom halo + block alignment
    n_blk = h_blk // tile_r
    n_row_blocks = h_pad // tile_r
    m1 = tile_r * w8

    # ---- input: ONE bf16 slab, zero-padded; no shifted copies in HBM ----
    x_nhwc = jnp.transpose(x, (0, 2, 3, 1)).astype(jnp.bfloat16)
    x_nhwc = jnp.pad(x_nhwc, ((0, 0), (0, h_blk - h), (0, w8 - w), (0, 0)))
    x_flat = x_nhwc.reshape(n * h_blk * w8, c_in)

    # ---- parity weight matrices (ConvTranspose taps used directly, no flip) ----
    # LHS channel blocks: 0 -> x[r,s], 1 -> x[r,s+1], 2 -> x[r+1,s], 3 -> x[r+1,s+1]
    pc = p2 - c_out

    def tap(kh, kw):
        return jnp.pad(weight_t[:, :, kh, kw], ((0, 0), (0, pc)))  # (C_in, P2)

    zero = jnp.zeros((c_in, p2), weight_t.dtype)
    w_ee = jnp.concatenate([tap(1, 1), zero,      zero,      zero],      axis=0)
    w_eo = jnp.concatenate([tap(1, 2), tap(1, 0), zero,      zero],      axis=0)
    w_oe = jnp.concatenate([tap(2, 1), zero,      tap(0, 1), zero],      axis=0)
    w_oo = jnp.concatenate([tap(2, 2), tap(2, 0), tap(0, 2), tap(0, 0)], axis=0)
    w_all = jnp.concatenate([w_ee, w_eo, w_oe, w_oo], axis=1).astype(jnp.bfloat16)

    # ---- eval BatchNorm folded to per-channel affine; conv bias kept separate
    # because ReLU sits between conv and norm ----
    scale = gamma / jnp.sqrt(run_var + eps)
    shift = beta - run_mean * scale

    def prow(v):
        return jnp.tile(jnp.pad(v.astype(jnp.float32), (0, pc)), 4)

    params = jnp.zeros((8, n4), jnp.float32)
    params = params.at[0].set(prow(conv_bias))
    params = params.at[1].set(prow(scale))
    params = params.at[2].set(prow(shift))

    split = (c_in >= 128) and (p2 >= 128)
    kernel = functools.partial(_upsample_conv_kernel, split=split)

    # ---- specs / grid ----
    res = dict(pipeline_mode=pl.Buffered(1)) if _SINGLE_BUFFER_OK else {}
    in_specs = [
        pl.BlockSpec((m1, c_in), lambda b, j: (b * n_blk + j, 0)),                 # x tile
        pl.BlockSpec((w8, c_in), lambda b, j: (b * h_blk + (j + 1) * tile_r, 0)),  # halo row
        pl.BlockSpec((4 * c_in, n4), lambda b, j: (0, 0), **res),                  # weights
        pl.BlockSpec((8, n4), lambda b, j: (0, 0), **res),                         # bias/scale/shift
    ]
    out_spec = pl.BlockSpec((tile_r, 2, w8, half),
                            lambda b, j: (b * n_blk + j, 0, 0, 0))
    grid = (n, n_row_blocks)

    w_buf = 1 if _SINGLE_BUFFER_OK else 2
    est = (m1 * (24 * c_in + 48 * p2)
           + w_buf * (4 * c_in) * n4 * 2 + w_buf * 8 * n4 * 4 + (1 << 20))
    vmem_limit = int(min(vmem_cap, max(32 << 20, 2 * est)))

    steps = n * n_row_blocks
    m_total = steps * m1
    if split:
        flops = 2 * m_total * (2 * c_in * half + 4 * c_in * half)
    else:
        flops = 2 * m_total * (4 * c_in) * n4
    bytes_accessed = (m_total * c_in * 2 + 4 * c_in * n4 * 2 + 8 * n4 * 4
                      + m_total * n4 * 2)
    cost = pl.CostEstimate(flops=int(flops), transcendentals=0,
                           bytes_accessed=int(bytes_accessed))

    out4 = pl.pallas_call(
        kernel,
        out_shape=jax.ShapeDtypeStruct((n * h_blk, 2, w8, half), jnp.bfloat16),
        grid=grid,
        in_specs=in_specs,
        out_specs=out_spec,
        compiler_params=pltpu.CompilerParams(
            dimension_semantics=("parallel", "parallel"),
            vmem_limit_bytes=vmem_limit,
        ),
        cost_estimate=cost,
    )(x_flat, x_flat, w_all, params)

    # free reinterpretation: (N*h_blk, 2, w8, 2, p2) row-major == (N, 2h_blk, 2w8, p2)
    out = out4.reshape(n, 2 * h_blk, 2 * w8, p2)
    out = out[:, : 2 * h, : 2 * w, :c_out]
    # final NHWC -> NCHW (bf16 read, one pass). Drop if the consumer accepts NHWC.
    return jnp.transpose(out, (0, 3, 1, 2)).astype(out_dtype)


def _reference(x, weight_t, conv_bias, gamma, beta, run_mean, run_var, eps=1e-5):
    """Pure-JAX reference (no Pallas) for sanity checking."""
    c_out = weight_t.shape[1]
    w_conv = jnp.transpose(weight_t[:, :, ::-1, ::-1], (1, 0, 2, 3))
    y = lax.conv_general_dilated(
        x, w_conv, window_strides=(1, 1),
        padding=((1, 2), (1, 2)),
        lhs_dilation=(2, 2),
        dimension_numbers=("NCHW", "OIHW", "NCHW"))
    y = y + conv_bias.reshape(1, c_out, 1, 1)
    y = jnp.maximum(y, 0.0)
    scale = gamma / jnp.sqrt(run_var + eps)
    shift = beta - run_mean * scale
    return y * scale.reshape(1, c_out, 1, 1) + shift.reshape(1, c_out, 1, 1)


if __name__ == "__main__":
    key = jax.random.PRNGKey(0)

    def make_case(k, n, c_in, c_out, h, w):
        ks = jax.random.split(k, 7)
        x = jax.random.normal(ks[0], (n, c_in, h, w), jnp.float32)
        weight_t = jax.random.normal(ks[1], (c_in, c_out, 3, 3), jnp.float32) * 0.1
        conv_bias = jax.random.normal(ks[2], (c_out,), jnp.float32) * 0.1
        gamma = 1.0 + 0.1 * jax.random.normal(ks[3], (c_out,), jnp.float32)
        beta = 0.1 * jax.random.normal(ks[4], (c_out,), jnp.float32)
        run_mean = 0.1 * jax.random.normal(ks[5], (c_out,), jnp.float32)
        run_var = 1.0 + 0.1 * jax.random.uniform(ks[6], (c_out,), jnp.float32)
        return (x, weight_t, conv_bias, gamma, beta, run_mean, run_var)

    k1, k2 = jax.random.split(key)
    cases = [
        (k1, 2, 4, 8, 16, 16),      # small-channel (packed-GEMM path)
        (k2, 1, 128, 128, 8, 8),    # large-channel (split even/odd-row path)
    ]

    for (ck, n, c_in, c_out, h, w) in cases:
        args = make_case(ck, n, c_in, c_out, h, w)
        out = jax.block_until_ready(upsample_conv(*args))
        assert out.shape == (n, c_out, 2 * h, 2 * w), out.shape
        out_f32 = out.astype(jnp.float32)

        # Strict check: reference fed the same bf16-quantized x / weights
        # (isolates algorithmic correctness from bf16 streaming/output error).
        xq = args[0].astype(jnp.bfloat16).astype(jnp.float32)
        wq = args[1].astype(jnp.bfloat16).astype(jnp.float32)
        ref_q = _reference(xq, wq, *args[2:])
        mag = 1.0 + float(jnp.max(jnp.abs(ref_q)))
        err_q = float(jnp.max(jnp.abs(out_f32 - ref_q)))
        assert err_q < 2e-2 * mag, (err_q, mag)

        # Loose semantic check vs the full-f32 reference.
        ref = _reference(*args)
        err = float(jnp.max(jnp.abs(out_f32 - ref)))
        assert err < 6e-2 * mag, (err, mag)

    print("KERNEL_OK")
</pallas_src>

<mosaic_0001>
module attributes {stable_mosaic.version = 11 : i64} {
  func.func @_k(%arg0: i32, %arg1: memref<8x128xf32, #tpu.memory_space<vmem>>, %arg2: memref<8x128xf32, #tpu.memory_space<vmem>>, %arg3: memref<8x128xf32, #tpu.memory_space<vmem>>) attributes {dimension_semantics = [#tpu.dimension_semantics<arbitrary>], iteration_bounds = array<i64: 2>, scalar_prefetch = 0 : i64, scratch_operands = 0 : i64, tpu.core_type = #tpu.core_type<tc>, window_params = [{transform_indices = @transform_0, window_bounds = array<i64: 8, 128>}, {pipeline_mode = #tpu.pipeline_mode<synchronous>, transform_indices = @transform_1, window_bounds = array<i64: 8, 128>}, {transform_indices = @transform_2, window_bounds = array<i64: 8, 128>}]} {
    %c0 = arith.constant 0 : index
    %c0_0 = arith.constant 0 : index
    %0 = vector.load %arg1[%c0, %c0_0] : memref<8x128xf32, #tpu.memory_space<vmem>>, vector<8x128xf32>
    %c0_1 = arith.constant 0 : index
    %c0_2 = arith.constant 0 : index
    %1 = vector.load %arg2[%c0_1, %c0_2] : memref<8x128xf32, #tpu.memory_space<vmem>>, vector<8x128xf32>
    %2 = arith.addf %0, %1 : vector<8x128xf32>
    %c0_3 = arith.constant 0 : index
    %c0_4 = arith.constant 0 : index
    %3 = vector.load %arg3[%c0_3, %c0_4] : memref<8x128xf32, #tpu.memory_space<vmem>>, vector<8x128xf32>
    tpu.vector_store %arg3[%c0_3, %c0_4], %2 {strides = array<i32>} : memref<8x128xf32, #tpu.memory_space<vmem>>, vector<8x128xf32>,
    return
  }
  func.func @transform_0(%arg0: i32) -> (i32, i32) {
    %c0_i32 = arith.constant 0 : i32
    %c0_i32_0 = arith.constant 0 : i32
    return %arg0, %c0_i32 : i32, i32
  }
  func.func @transform_1(%arg0: i32) -> (i32, i32) {
    %c0_i32 = arith.constant 0 : i32
    %c0_i32_0 = arith.constant 0 : i32
    %c0_i32_1 = arith.constant 0 : i32
    return %c0_i32, %c0_i32_0 : i32, i32
  }
  func.func @transform_2(%arg0: i32) -> (i32, i32) {
    %c0_i32 = arith.constant 0 : i32
    %c0_i32_0 = arith.constant 0 : i32
    return %arg0, %c0_i32 : i32, i32
  }
}

module attributes {stable_mosaic.version = 11 : i64} {
  func.func @_upsample_conv_kernel(%arg0: i32, %arg1: i32, %arg2: memref<64x4xbf16, #tpu.memory_space<vmem>>, %arg3: memref<16x4xbf16, #tpu.memory_space<vmem>>, %arg4: memref<16x256xbf16, #tpu.memory_space<vmem>>, %arg5: memref<8x256xf32, #tpu.memory_space<vmem>>, %arg6: memref<4x2x16x128xbf16, #tpu.memory_space<vmem>>) attributes {dimension_semantics = [#tpu.dimension_semantics<parallel>, #tpu.dimension_semantics<parallel>], iteration_bounds = array<i64: 2, 4>, scalar_prefetch = 0 : i64, scratch_operands = 0 : i64, tpu.core_type = #tpu.core_type<tc>, window_params = [{transform_indices = @transform_0, window_bounds = array<i64: 64, 4>}, {transform_indices = @transform_1, window_bounds = array<i64: 16, 4>}, {pipeline_mode = #tpu.pipeline_mode<synchronous>, transform_indices = @transform_2, window_bounds = array<i64: 16, 256>}, {pipeline_mode = #tpu.pipeline_mode<synchronous>, transform_indices = @transform_3, window_bounds = array<i64: 8, 256>}, {transform_indices = @transform_4, window_bounds = array<i64: 4, 2, 16, 128>}]} {
    %c0 = arith.constant 0 : index
    %c0_0 = arith.constant 0 : index
    %0 = vector.load %arg2[%c0, %c0_0] : memref<64x4xbf16, #tpu.memory_space<vmem>>, vector<64x4xbf16>
    %c16 = arith.constant 16 : index
    %c0_1 = arith.constant 0 : index
    %1 = vector.load %arg2[%c16, %c0_1] : memref<64x4xbf16, #tpu.memory_space<vmem>>, vector<48x4xbf16>
    %c0_2 = arith.constant 0 : index
    %c0_3 = arith.constant 0 : index
    %2 = vector.load %arg3[%c0_2, %c0_3] : memref<16x4xbf16, #tpu.memory_space<vmem>>, vector<16x4xbf16>
    %3 = tpu.concatenate %1, %2 in 0 : vector<48x4xbf16>, vector<16x4xbf16> -> vector<64x4xbf16>
    %cst = arith.constant 0.000000e+00 : bf16
    %4 = vector.broadcast %cst : bf16 to vector<1x4xbf16>
    %5 = tpu.iota {dimensions = array<i32: 0>} : vector<64x1xi32>
    %c16_i32 = arith.constant 16 : i32
    %c0_i32 = arith.constant 0 : i32
    %6 = arith.cmpi eq, %c16_i32, %c0_i32 : i32
    %c1_i32 = arith.constant 1 : i32
    %7 = arith.select %6, %c1_i32, %c16_i32 : i32
    %8 = vector.broadcast %7 : i32 to vector<64x1xi32>
    %9 = arith.remsi %5, %8 : vector<64x1xi32>
    %c0_i32_4 = arith.constant 0 : i32
    %10 = vector.broadcast %c0_i32_4 : i32 to vector<64x1xi32>
    %11 = arith.cmpi ne, %9, %10 : vector<64x1xi32>
    %c0_i32_5 = arith.constant 0 : i32
    %12 = vector.broadcast %c0_i32_5 : i32 to vector<64x1xi32>
    %13 = arith.cmpi slt, %9, %12 : vector<64x1xi32>
    %c0_i32_6 = arith.constant 0 : i32
    %14 = arith.cmpi slt, %7, %c0_i32_6 : i32
    %15 = vector.broadcast %14 : i1 to vector<64x1xi1>
    %16 = vector.broadcast %15 : vector<64x1xi1> to vector<64x1xi1>
    %17 = arith.xori %13, %16 : vector<64x1xi1>
    %18 = arith.andi %17, %11 : vector<64x1xi1>
    %19 = vector.broadcast %7 : i32 to vector<64x1xi32>
    %20 = arith.addi %9, %19 : vector<64x1xi32>
    %21 = arith.select %18, %20, %9 : vector<64x1xi1>, vector<64x1xi32>
    %c15_i32 = arith.constant 15 : i32
    %22 = vector.broadcast %c15_i32 : i32 to vector<64x1xi32>
    %23 = arith.cmpi ne, %21, %22 : vector<64x1xi32>
    %24 = vector.extract_strided_slice %0 {offsets = [1, 0], sizes = [63, 4], strides = [1, 1]} : vector<64x4xbf16> to vector<63x4xbf16>
    %25 = tpu.concatenate %24, %4 in 0 : vector<63x4xbf16>, vector<1x4xbf16> -> vector<64x4xbf16>
    %c0_i32_7 = arith.constant 0 : i32
    %26 = arith.sitofp %c0_i32_7 : i32 to bf16
    %27 = vector.shape_cast %23 : vector<64x1xi1> to vector<64x1xi1>
    %28 = vector.broadcast %27 : vector<64x1xi1> to vector<64x4xi1>
    %29 = vector.broadcast %26 : bf16 to vector<64x4xbf16>
    %30 = arith.select %28, %25, %29 : vector<64x4xi1>, vector<64x4xbf16>
    %31 = vector.extract_strided_slice %3 {offsets = [1, 0], sizes = [63, 4], strides = [1, 1]} : vector<64x4xbf16> to vector<63x4xbf16>
    %32 = tpu.concatenate %31, %4 in 0 : vector<63x4xbf16>, vector<1x4xbf16> -> vector<64x4xbf16>
    %c0_i32_8 = arith.constant 0 : i32
    %33 = arith.sitofp %c0_i32_8 : i32 to bf16
    %34 = vector.shape_cast %23 : vector<64x1xi1> to vector<64x1xi1>
    %35 = vector.broadcast %34 : vector<64x1xi1> to vector<64x4xi1>
    %36 = vector.broadcast %33 : bf16 to vector<64x4xbf16>
    %37 = arith.select %35, %32, %36 : vector<64x4xi1>, vector<64x4xbf16>
    %38 = tpu.concatenate %0, %30, %3, %37 in 1 : vector<64x4xbf16>, vector<64x4xbf16>, vector<64x4xbf16>, vector<64x4xbf16> -> vector<64x16xbf16>
    %c0_9 = arith.constant 0 : index
    %c0_10 = arith.constant 0 : index
    %39 = vector.load %arg4[%c0_9, %c0_10] : memref<16x256xbf16, #tpu.memory_space<vmem>>, vector<16x256xbf16>
    %cst_11 = arith.constant dense<0.000000e+00> : vector<64x256xf32>
    %40 = tpu.matmul %38, %39, %cst_11 {dimension_numbers = #tpu.dot_dimension_numbers<[1], [0], [0], [1], [0, 0, 1, 1], [], []>} : vector<64x16xbf16>, vector<16x256xbf16>, vector<64x256xf32> -> vector<64x256xf32>
    %41 = vector.extract_strided_slice %40 {offsets = [0, 0], sizes = [64, 128], strides = [1, 1]} : vector<64x256xf32> to vector<64x128xf32>
    %42 = vector.extract_strided_slice %40 {offsets = [0, 128], sizes = [64, 128], strides = [1, 1]} : vector<64x256xf32> to vector<64x128xf32>
    %c0_12 = arith.constant 0 : index
    %c0_13 = arith.constant 0 : index
    %43 = vector.load %arg5[%c0_12, %c0_13] : memref<8x256xf32, #tpu.memory_space<vmem>>, vector<1x128xf32>
    %44 = vector.broadcast %43 : vector<1x128xf32> to vector<64x128xf32>
    %45 = arith.addf %41, %44 : vector<64x128xf32>
    %cst_14 = arith.constant 0.000000e+00 : f32
    %46 = vector.broadcast %cst_14 : f32 to vector<64x128xf32>
    %47 = arith.maximumf %45, %46 : vector<64x128xf32>
    %c1 = arith.constant 1 : index
    %c0_15 = arith.constant 0 : index
    %48 = vector.load %arg5[%c1, %c0_15] : memref<8x256xf32, #tpu.memory_space<vmem>>, vector<1x128xf32>
    %49 = vector.broadcast %48 : vector<1x128xf32> to vector<64x128xf32>
    %50 = arith.mulf %47, %49 : vector<64x128xf32>
    %c2 = arith.constant 2 : index
    %c0_16 = arith.constant 0 : index
    %51 = vector.load %arg5[%c2, %c0_16] : memref<8x256xf32, #tpu.memory_space<vmem>>, vector<1x128xf32>
    %52 = vector.broadcast %51 : vector<1x128xf32> to vector<64x128xf32>
    %53 = arith.addf %50, %52 : vector<64x128xf32>
    %54 = arith.truncf %53 : vector<64x128xf32> to vector<64x128xbf16>
    %55 = vector.shape_cast %54 : vector<64x128xbf16> to vector<4x1x16x128xbf16>
    %c0_17 = arith.constant 0 : index
    %c0_18 = arith.constant 0 : index
    %c0_19 = arith.constant 0 : index
    %c0_20 = arith.constant 0 : index
    %56 = vector.load %arg6[%c0_17, %c0_18, %c0_19, %c0_20] : memref<4x2x16x128xbf16, #tpu.memory_space<vmem>>, vector<4x1x16x128xbf16>
    tpu.vector_store %arg6[%c0_17, %c0_18, %c0_19, %c0_20], %55 {strides = array<i32>} : memref<4x2x16x128xbf16, #tpu.memory_space<vmem>>, vector<4x1x16x128xbf16>,
    %c0_21 = arith.constant 0 : index
    %c128 = arith.constant 128 : index
    %57 = vector.load %arg5[%c0_21, %c128] : memref<8x256xf32, #tpu.memory_space<vmem>>, vector<1x128xf32>
    %58 = vector.broadcast %57 : vector<1x128xf32> to vector<64x128xf32>
    %59 = arith.addf %42, %58 : vector<64x128xf32>
    %cst_22 = arith.constant 0.000000e+00 : f32
    %60 = vector.broadcast %cst_22 : f32 to vector<64x128xf32>
    %61 = arith.maximumf %59, %60 : vector<64x128xf32>
    %c1_23 = arith.constant 1 : index
    %c128_24 = arith.constant 128 : index
    %62 = vector.load %arg5[%c1_23, %c128_24] : memref<8x256xf32, #tpu.memory_space<vmem>>, vector<1x128xf32>
    %63 = vector.broadcast %62 : vector<1x128xf32> to vector<64x128xf32>
    %64 = arith.mulf %61, %63 : vector<64x128xf32>
    %c2_25 = arith.constant 2 : index
    %c128_26 = arith.constant 128 : index
    %65 = vector.load %arg5[%c2_25, %c128_26] : memref<8x256xf32, #tpu.memory_space<vmem>>, vector<1x128xf32>
    %66 = vector.broadcast %65 : vector<1x128xf32> to vector<64x128xf32>
    %67 = arith.addf %64, %66 : vector<64x128xf32>
    %68 = arith.truncf %67 : vector<64x128xf32> to vector<64x128xbf16>
    %69 = vector.shape_cast %68 : vector<64x128xbf16> to vector<4x1x16x128xbf16>
    %c0_27 = arith.constant 0 : index
    %c1_28 = arith.constant 1 : index
    %c0_29 = arith.constant 0 : index
    %c0_30 = arith.constant 0 : index
    %70 = vector.load %arg6[%c0_27, %c1_28, %c0_29, %c0_30] : memref<4x2x16x128xbf16, #tpu.memory_space<vmem>>, vector<4x1x16x128xbf16>
    tpu.vector_store %arg6[%c0_27, %c1_28, %c0_29, %c0_30], %69 {strides = array<i32>} : memref<4x2x16x128xbf16, #tpu.memory_space<vmem>>, vector<4x1x16x128xbf16>,
    return
  }
  func.func @transform_0(%arg0: i32, %arg1: i32) -> (i32, i32) {
    %c5_i32 = arith.constant 5 : i32
    %0 = arith.muli %arg0, %c5_i32 : i32
    %1 = arith.addi %0, %arg1 : i32
    %c0_i32 = arith.constant 0 : i32
    %c0_i32_0 = arith.constant 0 : i32
    return %1, %c0_i32 : i32, i32
  }
  func.func @transform_1(%arg0: i32, %arg1: i32) -> (i32, i32) {
    %c20_i32 = arith.constant 20 : i32
    %0 = arith.muli %arg0, %c20_i32 : i32
    %c1_i32 = arith.constant 1 : i32
    %1 = arith.addi %arg1, %c1_i32 : i32
    %c4_i32 = arith.constant 4 : i32
    %2 = arith.muli %1, %c4_i32 : i32
    %3 = arith.addi %0, %2 : i32
    %c0_i32 = arith.constant 0 : i32
    %c0_i32_0 = arith.constant 0 : i32
    return %3, %c0_i32 : i32, i32
  }
  func.func @transform_2(%arg0: i32, %arg1: i32) -> (i32, i32) {
    %c0_i32 = arith.constant 0 : i32
    %c0_i32_0 = arith.constant 0 : i32
    %c0_i32_1 = arith.constant 0 : i32
    return %c0_i32, %c0_i32_0 : i32, i32
  }
  func.func @transform_3(%arg0: i32, %arg1: i32) -> (i32, i32) {
    %c0_i32 = arith.constant 0 : i32
    %c0_i32_0 = arith.constant 0 : i32
    %c0_i32_1 = arith.constant 0 : i32
    return %c0_i32, %c0_i32_0 : i32, i32
  }
  func.func @transform_4(%arg0: i32, %arg1: i32) -> (i32, i32, i32, i32) {
    %c5_i32 = arith.constant 5 : i32
    %0 = arith.muli %arg0, %c5_i32 : i32
    %1 = arith.addi %0, %arg1 : i32
    %c0_i32 = arith.constant 0 : i32
    %c0_i32_0 = arith.constant 0 : i32
    %c0_i32_1 = arith.constant 0 : i32
    %c0_i32_2 = arith.constant 0 : i32
    return %1, %c0_i32, %c0_i32_0, %c0_i32_1 : i32, i32, i32, i32
  }
}

</mosaic_0001>

<bundles_post_ra>
// kernel: tpu_custom_call.1
= control target key start
LH: loop header
LB: loop body
LE: loop exit
PB: predicated region body
PF: predicated region fallthrough
CT: control target
= control target key end

     0   :  { %7 = vsyncpa [#allocation3], 0  ;;  %s649_s0 = inlined_call_operand.hbm [shape: f32[16,128], index: 0, kind: input, shape index: {}]   ;;  %s650_s1 = inlined_call_operand.hbm [shape: f32[8,128], index: 1, kind: input, shape index: {}]   ;;  %s651_s2 = inlined_call_operand.hbm [shape: f32[16,128], index: 2, kind: output, shape index: {}]  }
   0x1   :  { %9 = vsyncpa [#allocation3 + $0x1], 0 }
   0x2   :  { %10 = vsyncpa [#allocation6], 0 }
   0x3   :  { %11 = vsyncpa [#allocation4], 0 }
   0x4   :  { %13 = vsyncpa [#allocation4 + $0x1], 0  ;;  %s483_s9 = smov 0   ;;  %s485_s10 = smov 0  }
   0x5   :  { %s487_s11 = smov 0   ;;  %s489_s12 = smov 0  }
   0x6 LB: > { %s504_s13 = sadd.s32 4294967295, %s463_s12   ;;  %s270_s14 = sadd.s32 4294967294, %s463_s12   ;;  %s463_s12 = sphi %s489_s12, %s674_s12   ;;  %s459_s11 = sphi %s487_s11, %s673_s11   ;;  %s455_s10 = sphi %s485_s10, %s672_s10   ;;  %s451_s9 = sphi %s483_s9, %s671_s9  }
   0x7   : > { %p39_p0 = scmp.ne.s32.totalorder %s455_s10, %s451_s9  ;;  %p652_p1 = scmp.eq.s32.totalorder %s504_s13, 0 }
   0x8   : > { %p90_p3 = scmp.eq.s32.totalorder %s270_s14, 1  ;;  %p271_p5 = scmp.ge.s32.totalorder %s463_s12, 1 }
   0x9   : > { %p513_p4 = por %p652_p1, %p39_p0  ;;  %p97_p7 = scmp.lt.s32.totalorder %s463_s12, 3 }
   0xa   : > { %p518_p6 = por %p90_p3, %p39_p0  ;;  %s465_s18 = smov [#allocation5]  }
   0xb   : > { %s656_s15 = scalar_select %p513_p4, 1, 0 }
   0xc   : > { %s657_s16 = scalar_select %p518_p6, 1, 0 }
   0xd   : > { %p523_p8 = pnand %p271_p5, %p97_p7  ;;  %s110_s19 = sshll.u32 %s465_s18, 4  ;;  %s111_s19 = int_to_ptr.vmem [resolvable:$true] %s110_s19 }
   0xe   : > { %s531_s20 = sadd.s32 1, %s463_s12   ;;  %s26_s24 = sadd.s32 1, %s459_s11 }
   0xf   : > { %s658_s17 = scalar_select %p523_p8, 1, 0 }
  0x10   : > { %p292_p10 = pneg %p523_p8  ;;  %s23_s22 = ssub.s32 %s463_s12, %s531_s20 }
  0x11   : > { %p541_p12 = scmp.eq.s32.totalorder %s23_s22, 0  ;;  %p33_p13 = scmp.ne.s32.totalorder %s459_s11, %s455_s10 }
  0x12   : > { %p535_p11 = pnand %p292_p10, %p652_p1  ;;  %s352_s25 = scalar_lea.vmem %s111_s19, 128 }
  0x13   : > { %p353_p3 = scmp.ne.s32.totalorder %s111_s19, %s352_s25  ;;  %p360_p9 = scmp.lt.s32.totalorder %s111_s19, %s111_s19 }
  0x14   : > { %p343_p0 = pneg %p535_p11  ;;  %p361_p2 = scmp.lt.s32.totalorder %s352_s25, %s352_s25 }
  0x16   : > { %p355_p5 = pnand %p353_p3, %p343_p0  ;;  %p362_p10 = por %p361_p2, %p360_p9 }
  0x18   : > { %p356_p7 = pneg %p355_p5 }
  0x1a   : > { %p363_p1 = pnand %p362_p10, %p356_p7 }
  0x1c   : > { %366 = shalt.err (!%p363_p1)
}
  0x1d   : > { %295 = dma.hbm_to_vmem [thread:$0]  (!%p535_p11), %s650_s1, 128, %s111_s19, [#allocation6]  }
  0x1e   : > { %s558_s28 = scalar_select %p541_p12, %s459_s11, %s26_s24  }
  0x1f   : > { %p34_p1 = scmp.eq.s32.totalorder %s463_s12, 0  ;;  %p661_p2 = scmp.eq.s32.totalorder %s504_s13, 1 }
  0x20   : > { %p305_p0 = scmp.lt.s32.totalorder %s463_s12, 2  ;;  %s121_s30 = sand.u32 1, %s459_s11  }
  0x21   : > { %p566_p9 = por %p661_p2, %p33_p13  ;;  %p35_p3 = por %p34_p1, %p33_p13 }
  0x22   : > { %s274_s3 = sshll.u32 %s121_s30, 3  ;;  %s275_s4 = sshll.u32 %s463_s12, 7 }
  0x23   : > { %s662_s29 = scalar_select %p566_p9, 1, 0 }
  0x24   : > { %s579_s7 = scalar_lea.hbm %s649_s0, %s275_s4  ;;  %s125_s8 = scalar_lea.vmem [#allocation2], %s274_s3 }
  0x25   : > { %s132_s14 = sshll.u32 %s125_s8, 4  ;;  %p581_p11 = pnand %p305_p0, %p35_p3  ;;  %s133_s14 = int_to_ptr.vmem [resolvable:$true] %s132_s14 }
  0x26   : > { %s122_s19 = scalar_lea.sflag [#allocation3], %s121_s30  ;;  %s367_s21 = scalar_lea.hbm %s579_s7, 128 }
  0x27   : > { %p368_p12 = scmp.ne.s32.totalorder %s579_s7, %s367_s21  ;;  %p369_p13 = pneg %p581_p11 }
  0x28   : > { %s372_s24 = scalar_lea.hbm %s649_s0, 256  ;;  %p373_p10 = scmp.lt.s32.totalorder %s579_s7, %s649_s0 }
  0x29   : > { %p370_p5 = pnand %p369_p13, %p368_p12  ;;  %p374_p1 = scmp.lt.s32.totalorder %s372_s24, %s367_s21 }
  0x2b   : > { %p371_p7 = pneg %p370_p5  ;;  %p375_p2 = por %p374_p1, %p373_p10 }
  0x2d   : > { %p376_p0 = pnand %p375_p2, %p371_p7 }
  0x2f   : > { %379 = shalt.err (!%p376_p0)
}
  0x30   : > { %s380_s27 = scalar_lea.vmem %s133_s14, 128  ;;  %s466_s30 = smov [#allocation2]  }
  0x31   : > { %p381_p3 = scmp.ne.s32.totalorder %s133_s14, %s380_s27  ;;  %s385_s3 = sshll.u32 %s466_s30, 4  ;;  %s386_s3 = int_to_ptr.vmem [resolvable:$false] %s385_s3 }
  0x32   : > { %s387_s4 = scalar_lea.vmem %s386_s3, 256  ;;  %p388_p12 = scmp.lt.s32.totalorder %s133_s14, %s386_s3 }
  0x33   : > { %p383_p6 = pnand %p381_p3, %p369_p13  ;;  %p389_p5 = scmp.lt.s32.totalorder %s387_s4, %s380_s27 }
  0x35   : > { %p384_p9 = pneg %p383_p6  ;;  %p390_p4 = por %p389_p5, %p388_p12 }
  0x37   : > { %p391_p8 = pnand %p390_p4, %p384_p9 }
  0x39   : > { %394 = shalt.err (!%p391_p8)
}
  0x3a   : > { %299 = dma.hbm_to_vmem [thread:$0]  (!%p581_p11), %s579_s7, 128, %s133_s14, %s122_s19  }
  0x3b   : > { %p664_p7 = scmp.ne.s32.totalorder %s658_s17, 0 }
  0x3c   : > { %s602_s5 = sand.u32 (!%p664_p7), 1, %s455_s10   ;;  %p665_p6 = scmp.ne.s32.totalorder (!%p664_p7), %s656_s15, 0 }
  0x3d   : > { %141 = sbr.rel (%p664_p7) target bundleno = 95 (0x5f), region = 28  ;;  %s277_s6 = sshll.u32 (!%p664_p7), %s602_s5, 3 }
  0x3e   : > { %s144_s8 = scalar_lea.sflag (!%p664_p7), [#allocation3], %s602_s5  ;;  %s147_s21 = scalar_lea.vmem (!%p664_p7), [#allocation2], %s277_s6 }
  0x42   : > { %438 = dma.done.wait (%p665_p6), %s144_s8, 128  }
  0x43   : > { %440 = vsyncadd (%p665_p6), %s144_s8, 4294967168  ;;  %p666_p4 = scmp.eq.s32.totalorder %s504_s13, 0 }
  0x45   : > { %442 = dma.done.wait (%p666_p4), [#allocation6], 128   ;;  %p667_p8 = pmov %p666_p4 }
  0x46   : > { %s171_s17 = scalar_lea.vmem [#allocation7], %s277_s6  ;;  %s281_s14 = sshll.u32 %s504_s13, 7  ;;  %v172_v0 = vld [vmem:[%s147_s21] sm:$0xff]  ;;  %v173_v1 = vld [vmem:[#allocation5] sm:$0xff] }
  0x47   : > { %444 = vsyncadd (%p667_p8), [#allocation6], 4294967168  ;;  %s190_s7 = sshll.u32 %s171_s17, 4  ;;  %v174_v2 = vadd.f32 %v173_v1, %v172_v0  ;;  %s188_s15 = scalar_lea.hbm %s651_s2, %s281_s14  ;;  %s191_s7 = int_to_ptr.vmem [resolvable:$true] %s190_s7 }
  0x48   : > { %s177_s22 = scalar_lea.sflag [#allocation4], %s602_s5  ;;  %s395_s23 = scalar_lea.vmem %s191_s7, 128 }
  0x49   : > { %175 = vst [vmem:[%s171_s17] sm:$0xff] %v174_v2  ;;  %p396_p9 = scmp.ne.s32.totalorder %s191_s7, %s395_s23  ;;  %p668_p11 = scmp.ne.s32.totalorder %s662_s29, 0 }
  0x4a   : > { %s467_s24 = smov [#allocation7]  }
  0x4b   : > { %p397_p13 = pnand %p396_p9, %p668_p11  ;;  %s399_s25 = sshll.u32 %s467_s24, 4  ;;  %s400_s25 = int_to_ptr.vmem [resolvable:$false] %s399_s25 }
  0x4c   : > { %s401_s26 = scalar_lea.vmem %s400_s25, 256  ;;  %p402_p1 = scmp.lt.s32.totalorder %s191_s7, %s400_s25 }
  0x4d   : > { %p398_p10 = pneg %p397_p13  ;;  %p403_p2 = scmp.lt.s32.totalorder %s401_s26, %s395_s23 }
  0x4f   : > { %p404_p0 = por %p403_p2, %p402_p1 }
  0x51   : > { %p405_p3 = pnand %p404_p0, %p398_p10 }
  0x53   : > { %408 = shalt.err (!%p405_p3)
}
  0x54   : > { %s409_s13 = scalar_lea.hbm %s188_s15, 128  ;;  %s413_s3 = scalar_lea.hbm %s651_s2, 256 }
  0x55   : > { %p410_p12 = scmp.ne.s32.totalorder %s188_s15, %s409_s13  ;;  %p414_p6 = scmp.lt.s32.totalorder %s188_s15, %s651_s2 }
  0x56   : > { %p415_p4 = scmp.lt.s32.totalorder %s413_s3, %s409_s13 }
  0x57   : > { %p411_p5 = pnand %p410_p12, %p668_p11 }
  0x58   : > { %p416_p8 = por %p415_p4, %p414_p6 }
  0x59   : > { %p412_p7 = pneg %p411_p5 }
  0x5b   : > { %p417_p9 = pnand %p416_p8, %p412_p7 }
  0x5d   : > { %420 = shalt.err (!%p417_p9)
}
  0x5e   : > { %290 = dma.vmem_to_hbm [thread:$0]  (%p668_p11), %s191_s7, 128, %s188_s15, %s177_s22  }
  0x5f PF: > { %s202_s6 = sand.u32 1, %s451_s9   ;;  %p669_p13 = scmp.ne.s32.totalorder %s657_s16, 0 }
  0x60   : > { %p670_p10 = scmp.ge.s32.totalorder %s463_s12, 2  ;;  %s203_s8 = scalar_lea.sflag [#allocation4], %s202_s6 }
  0x62   : > { %p301_p1 = pnand %p670_p10, %p669_p13 }
  0x64   : > { %p302_p2 = pneg %p301_p1 }
  0x66   : > { %446 = dma.done.wait (%p302_p2), %s203_s8, 128  }
  0x67   : > { %448 = vsyncadd (%p302_p2), %s203_s8, 4294967168  ;;  %p16_p0 = scmp.ge.s32.totalorder %s531_s20, 4   ;;  %s671_s9 = smov %s455_s10 }
  0x68   : > { %s672_s10 = smov %s459_s11  ;;  %s673_s11 = smov %s558_s28 }
  0x69   : > { %s674_s12 = smov %s531_s20  ;;  %18 = sbr.rel (!%p16_p0) target bundleno = 6 (0x6), region = 77 }
  0x6e   :  { %208 = vsyncpa [#allocation3], 1 }
  0x6f   :  { %210 = vsyncpa [#allocation3 + $0x1], 1 }
  0x70   :  { %211 = vsyncpa [#allocation6], 1 }
  0x71   :  { %212 = vsyncpa [#allocation4], 1 }
  0x72   :  { %214 = vsyncpa [#allocation4 + $0x1], 1 }

// kernel: tile.23
= control target key start
LH: loop header
LB: loop body
LE: loop exit
PB: predicated region body
PF: predicated region fallthrough
CT: control target
= control target key end

     0   :  { %s22_s0 = inlined_call_operand.vmem [shape: f32[64], index: 0, kind: input, shape index: {}]   ;;  %s23_s1 = inlined_call_operand.vmem [shape: f32[4,64], index: 1, kind: output, shape index: {}]  }
   0x1   :  { %v4_v0 = vld [vmem:[%s22_s0] ss:$0 sm:$0xff] }
   0x2   :  { %5 = vst [vmem:[%s23_s1] sm:$0xf] %v4_v0 }

// kernel: upsample_conv.1
= control target key start
LH: loop header
LB: loop body
LE: loop exit
PB: predicated region body
PF: predicated region fallthrough
CT: control target
= control target key end

     0   :  { %s1189_s15 = smov 0   ;;  %s1191_s16 = smov 0   ;;  %s1453_s0 = inlined_call_operand.vmem [shape: bf16[640,4], index: 0, kind: input, shape index: {}, may-alias: {0,1}]   ;;  %s1454_s1 = inlined_call_operand.vmem [shape: bf16[640,4], index: 1, kind: input, shape index: {}, may-alias: {0,1}]   ;;  %s1455_s2 = inlined_call_operand.vmem [shape: bf16[16,256], index: 2, kind: input, shape index: {}]   ;;  %s1456_s3 = inlined_call_operand.vmem [shape: f32[8,256], index: 3, kind: input, shape index: {}]   ;;  %s1457_s4 = inlined_call_operand.vmem [shape: bf16[40,2,16,128], index: 4, kind: output, shape index: {}]  }
   0x1   :  { %s1193_s17 = smov 0   ;;  %s1195_s18 = smov 0  }
   0x2   :  { %s1197_s19 = smov 0  }
   0x3 LB: > { %s23_s20 = sadd.s32 1, %s1149_s17  ;;  %s26_s21 = sadd.s32 1, %s1153_s18  ;;  %s1157_s19 = sphi %s1197_s19, %s14_s19   ;;  %s1153_s18 = sphi %s1195_s18, %s1473_s18   ;;  %s1149_s17 = sphi %s1193_s17, %s1472_s17   ;;  %s1145_s16 = sphi %s1191_s16, %s1471_s16   ;;  %s1141_s15 = sphi %s1189_s15, %s1470_s15  }
   0x4   : > { %p24_p0 = scmp.ge.s32.totalorder %s23_s20, 4  ;;  %p944_p1 = scmp.ge.s32.totalorder %s1157_s19, 1 }
   0x5   : > { %p214_p2 = scmp.lt.s32.totalorder %s1157_s19, 9 }
   0x6   : > { %s1475_s20 = smov (%p24_p0, %s23_s20), 0  ;;  %s1477_s21 = smov (!%p24_p0, %s26_s21), %s1153_s18 }
   0x7   : > { %p215_p3 = pnand %p944_p1, %p214_p2  ;;  %p28_p4 = scmp.ge.s32.totalorder %s1477_s21, 2 }
   0x8   : > { %s254_s22 = smul.u32 (!%p215_p3), 5, %s1145_s16  ;;  %s998_s24 = sshll.u32 (!%p215_p3), %s1141_s15, 2 }
   0x9   : > { %s1479_s21 = smov (%p28_p4, %s1477_s21), 0  ;;  %218 = sbr.rel (%p215_p3) target bundleno = 372 (0x174), region = 36 }
   0xa   : > { %s264_s23 = smul.u32 (!%p215_p3), 20, %s1145_s16  ;;  %s1221_s25 = sadd.s32 (!%p215_p3), %s1141_s15, %s254_s22 }
   0xb   : > { %s999_s26 = sadd.s32 (!%p215_p3), 4, %s998_s24  ;;  %s945_s27 = sshll.u32 (!%p215_p3), %s1221_s25, 3 }
   0xc   : > { %s267_s28 = sadd.s32 (!%p215_p3), %s999_s26, %s264_s23  ;;  %p257_p5 = scmp.lt.s32.totalorder (!%p215_p3), %s945_s27, 79 }
   0xd   : > { %s948_s29 = sshll.u32 (!%p215_p3), %s267_s28, 1  ;;  %s1161_s12 = smov (!%p215_p3), 8  }
   0xe   : > { %v322_v0 = vlaneseq  ;;  %v1159_v1 = vmov 0   ;;  %p269_p6 = scmp.lt.s32.totalorder %s948_s29, 79  ;;  %s1481_s27 = smov (!%p257_p5, %s945_s27), 79  ;;  %vm1160_vm0 = vmmov 1   ;;  %vm476_vm5 = vcmask 1047552  }
   0xf   : > { %678 = vmatprep.mubr.bf16.mxu1 %v1159_v1  ;;  %658 = vmatprep.mubr.bf16.mxu0 %v1159_v1  ;;  %vm495_vm1 = vmpackc.low %vm1160_vm0, %vm1160_vm0  ;;  %s946_s30 = sshll.u32 %s1481_s27, 2  ;;  %vm440_vm6 = vsmask.f32 7424  ;;  %v1116_v28 = vld [vmem:[%s1455_s2 + $0x4] ss:$8 sps:$4 sm:$0xff]   ;;  %s1162_s22 = smov 4  }
  0x10   : > { %v323_v2 = vshrl.u32 %v322_v0, 7  ;;  %s1483_s29 = smov (!%p269_p6, %s948_s29), 79  ;;  %s260_s7 = scalar_lea.vmem %s1453_s0, %s946_s30  ;;  %v1228_v10 = vsel %vm495_vm1, 65537, %v1159_v1  ;;  %v1118_v33 = vld [vmem:[%s1455_s2] ss:$8 sps:$4 sm:$0xff]   ;;  %1064 = vmatprep.subr.bf16.mxu1 %v1116_v28  ;;  %640 = vmatprep.subr.bf16.mxu0 %v1116_v28  ;;  %vm1290_vm12 = vmand %vm476_vm5, %vm440_vm6  ;;  %vm578_vm1 = vcmask 31744  }
  0x11   : > { %s949_s8 = sshll.u32 %s1483_s29, 2  ;;  %v1234_v13 = vld [vmem:[%s260_s7 + $0x8] sm:$0xff]   ;;  %v1243_v15 = vld [vmem:[%s260_s7 + $0x10] sm:$0xff]   ;;  %v1248_v17 = vld [vmem:[%s260_s7 + $0x18] sm:$0xff]   ;;  %1065 = vmatpush1.bf16.msra.mxu1 %v1118_v33  ;;  %641 = vmatpush1.bf16.msra.mxu0 %v1118_v33  ;;  %s1163_s23 = smov 12  }
  0x12   : > { %v324_v3 = vadd.s32 8, %v323_v2  ;;  %v328_v4 = vadd.s32 40, %v323_v2  ;;  %v330_v5 = vadd.s32 56, %v323_v2  ;;  %v326_v6 = vadd.s32 24, %v323_v2  ;;  %s272_s11 = scalar_lea.vmem %s1454_s1, %s949_s8  ;;  %558 = vrot.lane.b32.xlu1 %v1234_v13, %s1161_s12  ;;  %560 = vrot.lane.b32.xlu0 %v1243_v15, %s1161_s12  ;;  %v1257_v21 = vld [vmem:[%s260_s7] sm:$0xff]   ;;  %s950_s27 = sshll.u32 %s1221_s25, 2 }
  0x13   : > { %v449_v18 = vshll.u32 %v1234_v13, 16  ;;  %v1114_v19 = vld [vmem:[%s272_s11] sm:$0xff]   ;;  %v465_v24 = vshll.u32 %v1248_v17, 16  ;;  %v469_v25 = vshrl.u32 %v1248_v17, 16  ;;  %v457_v27 = vshll.u32 %v1243_v15, 16  ;;  %p281_p7 = scmp.lt.s32.totalorder %s950_s27, 39 }
  0x14   : > { %v342_v7 = vand.u32 15, %v324_v3  ;;  %v370_v8 = vand.u32 15, %v328_v4  ;;  %v384_v9 = vand.u32 15, %v330_v5  ;;  %v356_v12 = vand.u32 15, %v326_v6  ;;  %v1375_v48 = vld [vmem:[%s1456_s3 + $0x2] ss:$0 sm:$0xff] }
  0x15   : > { %v451_v22 = vrot.slane %v449_v18, 1  ;;  %v532_v26 = vshll.u32 %v1114_v19, 16  ;;  %v442_v29 = vshrl.u32 %v1257_v21, 16  ;;  %v444_v30 = vshll.u32 %v1257_v21, 16  ;;  %s1485_s27 = smov (!%p281_p7, %s950_s27), 39 }
  0x16   : > { %vm428_vm2 = vcmp.ne.s32.totalorder %v342_v7, 15  ;;  %vm1230_vm4 = vcmp.ne.s32.totalorder %v370_v8, 15  ;;  %vm1239_vm7 = vcmp.ne.s32.totalorder %v384_v9, 15  ;;  %vm1253_vm8 = vcmp.ne.s32.totalorder %v356_v12, 15  ;;  %562 = vrot.lane.b32.xlu1 %v1248_v17, %s1161_s12  ;;  %s1000_s11 = sshll.u32 %s1485_s27, 4 }
  0x17   : > { %vm496_vm3 = vmpackc.low %vm428_vm2, %vm428_vm2  ;;  %v461_v32 = vshrl.u32 %v1243_v15, 16  ;;  %v467_v34 = vrot.slane %v465_v24, 1  ;;  %v534_v36 = vrot.slane %v532_v26, 1  ;;  %v459_v37 = vrot.slane %v457_v27, 1  ;;  %s1402_s14 = scalar_lea.vmem %s1457_s4, %s1000_s11 }
  0x18   : > { %v504_v16 = vsel %vm496_vm3, 65537, %v1159_v1  ;;  %vm500_vm9 = vmpackc.low %vm1230_vm4, %vm1230_vm4  ;;  %v446_v38 = vrot.slane %v444_v30, 1  ;;  %v453_v40 = vshrl.u32 %v1234_v13, 16  ;;  %v536_v41 = vshrl.u32 %v1114_v19, 16 }
  0x19   : > { %v958_v23 = vcombine.low %v1228_v10, %v504_v16  ;;  %v508_v31 = vsel %vm500_vm9, 65537, %v1159_v1  ;;  %vm502_vm10 = vmpackc.low %vm1239_vm7, %vm1239_vm7  ;;  %v471_v42 = vor.u32 %v469_v25, %v467_v34  ;;  %v463_v44 = vor.u32 %v461_v32, %v459_v37 }
  0x1a   : > { %v960_v35 = vcombine.low %v1228_v10, %v508_v31  ;;  %v510_v39 = vsel %vm502_vm10, 65537, %v1159_v1  ;;  %564 = vrot.lane.b32.xlu1 %v1114_v19, %s1161_s12  ;;  %v447_v47 = vor.u32 %v446_v38, %v442_v29  ;;  %vm498_vm14 = vmpackc.low %vm1253_vm8, %vm1253_vm8  ;;  %v455_v51 = vor.u32 %v453_v40, %v451_v22 }
  0x1b   : > { %v961_v46 = vcombine.low %v1228_v10, %v510_v39  ;;  %vm1296_vm13 = vcmp.ne.s16.totalorder %v958_v23, 0  ;;  %v535_v49 = vsel %vm440_vm6, %v471_v42, %v534_v36  ;;  %v468_v50 = vsel %vm440_vm6, %v463_v44, %v467_v34 }
  0x1c   : > { %vm1284_vm11 = vcmp.ne.s16.totalorder %v960_v35, 0  ;;  %v538_v52 = vor.u32 %v536_v41, %v534_v36  ;;  %v452_v53 = vsel %vm440_vm6, %v447_v47, %v451_v22  ;;  %v478_v55 = vsel %vm1290_vm12, %v471_v42, 0  ;;  %v1360_v36 = vld [vmem:[%s1456_s3 + $0x1] ss:$0 sm:$0xff]  ;;  %v1366_v42 = vld [vmem:[%s1456_s3 + $0x9] ss:$0 sm:$0xff] }
  0x1d   : > { %v544_v54 = vsel %vm1284_vm11, %v535_v49, 0  ;;  %vm526_vm15 = vcmp.ne.s16.totalorder %v961_v46, 0  ;;  %v527_v56 = vsel %vm1296_vm13, %v452_v53, 0  ;;  %v506_v57 = vsel %vm498_vm14, 65537, %v1159_v1 }
  0x1e   : > { %550 = vrot.lane.b32.xlu0 %v527_v56, %s1162_s22  ;;  %574 = vrot.lane.b32.xlu1 %v544_v54, %s1163_s23  ;;  %v529_v58 = vsel %vm1284_vm11, %v468_v50, 0  ;;  %v530_v59 = vsel %vm526_vm15, %v478_v55, 0  ;;  %v460_v60 = vsel %vm440_vm6, %v455_v51, %v459_v37  ;;  %v541_v61 = vsel %vm1290_vm12, %v538_v52, 0 }
  0x1f   : > { %v959_v62 = vcombine.low %v1228_v10, %v506_v57  ;;  %v542_v63 = vsel %vm1296_vm13, %v460_v60, 0  ;;  %v545_v0 = vsel %vm526_vm15, %v541_v61, 0  ;;  %vm596_vm2 = vcmask 97280  }
  0x20   : > { %vm587_vm3 = vcmask 64512   ;;  %vm617_vm4 = vcmask 130048  }
  0x21   : > { %vm524_vm0 = vcmp.ne.s16.totalorder %v959_v62, 0 }
  0x22   : > { %554 = vrot.lane.b32.xlu0 %v529_v58, %s1162_s22  ;;  %556 = vrot.lane.b32.xlu1 %v530_v59, %s1162_s22  ;;  %v528_v2 = vsel %vm524_vm0, %v460_v60, 0  ;;  %v543_v3 = vsel %vm524_vm0, %v468_v50, 0  ;;  %v1386_v58 = vld [vmem:[%s1456_s3 + $0xa] ss:$0 sm:$0xff] }
  0x26   : > { %570 = vrot.lane.b32.xlu0 %v542_v63, %s1163_s23  ;;  %576 = vrot.lane.b32.xlu1 %v545_v0, %s1163_s23 }
  0x2a   : > { %552 = vrot.lane.b32.xlu0 %v528_v2, %s1162_s22 }
  0x2e   : > { %572 = vrot.lane.b32.xlu0 %v543_v3, %s1163_s23 }
  0x84   : > { %v559_v4 = vpop.permute.xlu1 %558  ;;  %v561_v6 = vpop.permute.xlu0 %560 }
  0x88   : > { %v563_v5 = vpop.permute.xlu1 %562 }
  0x8c   : > { %v565_v7 = vpop.permute.xlu1 %564 }
  0x90   : > { %v551_v8 = vpop.permute.xlu0 %550  ;;  %v575_v9 = vpop.permute.xlu1 %574 }
  0x91   : > { %v580_v11 = vsel %vm578_vm1, %v1257_v21, %v551_v8 }
  0x92   : > { %v589_v19 = vsel %vm587_vm3, %v580_v11, %v559_v4 }
  0x94   : > { %v555_v10 = vpop.permute.xlu0 %554  ;;  %v557_v16 = vpop.permute.xlu1 %556 }
  0x95   : > { %v584_v12 = vsel %vm578_vm1, %v1243_v15, %v555_v10  ;;  %v586_v15 = vsel %vm578_vm1, %v1248_v17, %v557_v16  ;;  %v1352_v17 = vld [vmem:[%s1456_s3 + $0x8] ss:$0 sm:$0xff] }
  0x96   : > { %v593_v14 = vsel %vm587_vm3, %v584_v12, %v563_v5  ;;  %v595_v25 = vsel %vm587_vm3, %v586_v15, %v565_v7 }
  0x97   : > { %v602_v18 = vsel %vm596_vm2, %v593_v14, %v575_v9 }
  0x98   : > { %966 = vmatmul.mubr.msk.bf16.vlgmr.msra.gmra.mxu1 %vm617_vm4, %v602_v18  ;;  %v571_v20 = vpop.permute.xlu0 %570  ;;  %v577_v21 = vpop.permute.xlu1 %576 }
  0x99   : > { %v598_v22 = vsel %vm596_vm2, %v589_v19, %v571_v20  ;;  %688 = vmatprep.mubr.bf16.mxu1 %v1159_v1  ;;  %v604_v26 = vsel %vm596_vm2, %v595_v25, %v577_v21 }
  0x9a   : > { %964 = vmatmul.mubr.msk.bf16.vlgmr.msra.gmra.mxu0 %vm617_vm4, %v598_v22 }
  0x9b   : > { %668 = vmatprep.mubr.bf16.mxu0 %v1159_v1  ;;  %v1346_v1 = vld [vmem:[%s1456_s3] ss:$0 sm:$0xff] }
  0x9c   : > { %v553_v23 = vpop.permute.xlu0 %552 }
  0x9d   : > { %v582_v24 = vsel %vm578_vm1, %v1234_v13, %v553_v23 }
  0x9e   : > { %v591_v27 = vsel %vm587_vm3, %v582_v24, %v561_v6 }
  0xa0   : > { %967 = vmatmul.mubr.msk.bf16.gmra.mxu1 %vm617_vm4, %v604_v26  ;;  %v573_v28 = vpop.permute.xlu0 %572 }
  0xa1   : > { %v600_v29 = vsel %vm596_vm2, %v591_v27, %v573_v28 }
  0xa2   : > { %965 = vmatmul.mubr.msk.bf16.gmra.mxu0 %vm617_vm4, %v600_v29 }
 0x158   : > { %v680_v13 = vpop.f32.mrf.mxu1 }
 0x159   : > { %v704_v30 = vadd.f32 %v1346_v1, %v680_v13 }
 0x15a   : > { %v660_v31 = vpop.f32.mrf.mxu0  ;;  %v682_v32 = vpop.f32.mrf.mxu1 }
 0x15b   : > { %v712_v33 = vmax.f32 %v704_v30, 0.0  ;;  %v700_v34 = vadd.f32 %v1346_v1, %v660_v31  ;;  %v779_v35 = vadd.f32 %v1352_v17, %v682_v32 }
 0x15c   : > { %v662_v37 = vpop.f32.mrf.mxu0  ;;  %v684_v38 = vpop.f32.mrf.mxu1 }
 0x15d   : > { %v708_v39 = vmax.f32 %v700_v34, 0.0  ;;  %v787_v40 = vmax.f32 %v779_v35, 0.0  ;;  %v775_v41 = vadd.f32 %v1352_v17, %v662_v37  ;;  %v705_v43 = vadd.f32 %v1346_v1, %v684_v38 }
 0x15e   : > { %v664_v44 = vpop.f32.mrf.mxu0  ;;  %v686_v45 = vpop.f32.mrf.mxu1  ;;  %v721_v46 = vmul.f32 %v1360_v36, %v712_v33 }
 0x15f   : > { %v783_v47 = vmax.f32 %v775_v41, 0.0  ;;  %v717_v49 = vmul.f32 %v1360_v36, %v708_v39  ;;  %v713_v50 = vmax.f32 %v705_v43, 0.0  ;;  %v701_v51 = vadd.f32 %v1346_v1, %v664_v44 }
 0x160   : > { %v780_v52 = vadd.f32 %v1352_v17, %v686_v45  ;;  %v666_v53 = vpop.f32.mrf.mxu0  ;;  %v690_v54 = vpop.f32.mrf.mxu1  ;;  %v796_v55 = vmul.f32 %v1366_v42, %v787_v40  ;;  %v730_v2 = vadd.f32 %v1375_v48, %v721_v46 }
 0x161   : > { %v792_v56 = vmul.f32 %v1366_v42, %v783_v47  ;;  %v776_v57 = vadd.f32 %v1352_v17, %v666_v53  ;;  %v722_v59 = vmul.f32 %v1360_v36, %v713_v50  ;;  %v709_v60 = vmax.f32 %v701_v51, 0.0 }
 0x162   : > { %v788_v61 = vmax.f32 %v780_v52, 0.0  ;;  %v706_v62 = vadd.f32 %v1346_v1, %v690_v54  ;;  %v670_v63 = vpop.f32.mrf.mxu0  ;;  %v692_v0 = vpop.f32.mrf.mxu1  ;;  %v726_v6 = vadd.f32 %v1375_v48, %v717_v49  ;;  %v805_v12 = vadd.f32 %v1386_v58, %v796_v55 }
 0x163   : > { %v784_v3 = vmax.f32 %v776_v57, 0.0  ;;  %v702_v4 = vadd.f32 %v1346_v1, %v670_v63  ;;  %v781_v5 = vadd.f32 %v1352_v17, %v692_v0  ;;  %v731_v7 = vadd.f32 %v1375_v48, %v722_v59 }
 0x164   : > { %v718_v8 = vmul.f32 %v1360_v36, %v709_v60  ;;  %v797_v9 = vmul.f32 %v1366_v42, %v788_v61  ;;  %v672_v10 = vpop.f32.mrf.mxu0  ;;  %v694_v11 = vpop.f32.mrf.mxu1  ;;  %v714_v16 = vmax.f32 %v706_v62, 0.0  ;;  %v801_v19 = vadd.f32 %v1386_v58, %v792_v56 }
 0x165   : > { %v793_v14 = vmul.f32 %v1366_v42, %v784_v3  ;;  %v777_v18 = vadd.f32 %v1352_v17, %v672_v10  ;;  %v1030_v20 = vpack.c.bf16 %v731_v7, %v730_v2  ;;  %v710_v24 = vmax.f32 %v702_v4, 0.0 }
 0x166   : > { %v727_v22 = vadd.f32 %v1375_v48, %v718_v8  ;;  %v806_v15 = vadd.f32 %v1386_v58, %v797_v9  ;;  %v674_v21 = vpop.f32.mrf.mxu0  ;;  %v789_v25 = vmax.f32 %v781_v5, 0.0  ;;  %v696_v27 = vpop.f32.mrf.mxu1  ;;  %v707_v13 = vadd.f32 %v1346_v1, %v694_v11 }
 0x167   : > { %v802_v23 = vadd.f32 %v1386_v58, %v793_v14  ;;  %v785_v26 = vmax.f32 %v777_v18, 0.0  ;;  %1058 = vst [vmem:[%s1402_s14 + $0x20] sm:$0xff] %v1030_v20   ;;  %v723_v32 = vmul.f32 %v1360_v36, %v714_v16  ;;  %v703_v34 = vadd.f32 %v1346_v1, %v674_v21 }
 0x168   : > { %v1020_v28 = vpack.c.bf16 %v727_v22, %v726_v6  ;;  %v1050_v29 = vpack.c.bf16 %v806_v15, %v805_v12  ;;  %v676_v30 = vpop.f32.mrf.mxu0  ;;  %v715_v33 = vmax.f32 %v707_v13, 0.0  ;;  %v782_v35 = vadd.f32 %v1352_v17, %v696_v27 }
 0x169   : > { %v1040_v31 = vpack.c.bf16 %v802_v23, %v801_v19  ;;  %v778_v37 = vadd.f32 %v1352_v17, %v676_v30  ;;  %v719_v38 = vmul.f32 %v1360_v36, %v710_v24  ;;  %v798_v39 = vmul.f32 %v1366_v42, %v789_v25 }
 0x16a   : > { %1021 = vst [vmem:[%s1402_s14] sm:$0xff] %v1020_v28   ;;  %1062 = vst [vmem:[%s1402_s14 + $0x28] sm:$0xff] %v1050_v29   ;;  %v794_v40 = vmul.f32 %v1366_v42, %v785_v26  ;;  %v724_v41 = vmul.f32 %v1360_v36, %v715_v33  ;;  %v711_v43 = vmax.f32 %v703_v34, 0.0  ;;  %v790_v44 = vmax.f32 %v782_v35, 0.0 }
 0x16b   : > { %1060 = vst [vmem:[%s1402_s14 + $0x8] sm:$0xff] %v1040_v31   ;;  %v786_v45 = vmax.f32 %v778_v37, 0.0  ;;  %v732_v46 = vadd.f32 %v1375_v48, %v723_v32  ;;  %v728_v50 = vadd.f32 %v1375_v48, %v719_v38  ;;  %v807_v51 = vadd.f32 %v1386_v58, %v798_v39 }
 0x16c   : > { %v733_v1 = vadd.f32 %v1375_v48, %v724_v41  ;;  %v720_v17 = vmul.f32 %v1360_v36, %v711_v43  ;;  %v799_v47 = vmul.f32 %v1366_v42, %v790_v44  ;;  %v803_v52 = vadd.f32 %v1386_v58, %v794_v40 }
 0x16d   : > { %v795_v49 = vmul.f32 %v1366_v42, %v786_v45 }
 0x16e   : > { %v1035_v53 = vpack.c.bf16 %v733_v1, %v732_v46  ;;  %v729_v54 = vadd.f32 %v1375_v48, %v720_v17  ;;  %v808_v55 = vadd.f32 %v1386_v58, %v799_v47 }
 0x16f   : > { %v804_v56 = vadd.f32 %v1386_v58, %v795_v49 }
 0x170   : > { %1059 = vst [vmem:[%s1402_s14 + $0x30] sm:$0xff] %v1035_v53   ;;  %v1025_v36 = vpack.c.bf16 %v729_v54, %v728_v50  ;;  %v1055_v57 = vpack.c.bf16 %v808_v55, %v807_v51 }
 0x171   : > { %v1045_v59 = vpack.c.bf16 %v804_v56, %v803_v52 }
 0x172   : > { %1057 = vst [vmem:[%s1402_s14 + $0x10] sm:$0xff] %v1025_v36   ;;  %1063 = vst [vmem:[%s1402_s14 + $0x38] sm:$0xff] %v1055_v57  }
 0x173   : > { %1061 = vst [vmem:[%s1402_s14 + $0x18] sm:$0xff] %v1045_v59  }
 0x174 PF: > { %s14_s19 = sadd.s32 1, %s1157_s19   ;;  %s1470_s15 = smov %s1149_s17 }
 0x175   : > { %p11_p8 = scmp.ge.s32.totalorder %s14_s19, 10   ;;  %s1471_s16 = smov %s1153_s18 }
 0x176   : > { %s1472_s17 = smov %s1475_s20  ;;  %s1473_s18 = smov %s1479_s21 }
 0x177   :  { %13 = sbr.rel (!%p11_p8) target bundleno = 3 (0x3), region = 70 }

</bundles_post_ra>
